<compile_context>
chip_gen: v7x
topology: tpu7x:2x2x1
jax: 0.10.0
libtpu: 0.0.40
codegen_flags: <defaults>
</compile_context>

<pallas_src>
import functools

import numpy as np
import jax
import jax.numpy as jnp
from jax import lax
from jax.experimental import pallas as pl
from jax.experimental.pallas import tpu as pltpu

EPS = 1e-12  # TF-style LayerNorm: epsilon inside the sqrt (matches the PyTorch module)


def _dist_filter_kernel(xm_ref,           # (bt, S, H)  f32   mean branch input
                        xc_ref,           # (bt, S, H)  f32   cov branch input
                        r2_ref,           # (2Fp, S)    bf16  stacked rfft basis [Re; Im]
                        cr_ref,           # (S, Fp)     bf16  irfft basis (real part)
                        ci_ref,           # (S, Fp)     bf16  irfft basis (imag part)
                        wr_ref, wi_ref,   # (Fp, 2H)    f32   merged complex filter weights
                        g_ref, b_ref,     # (1, H)      f32   LayerNorm affine
                        om_ref,           # (bt, S, H)  f32   mean branch output
                        oc_ref):          # (bt, S, H)  f32   cov branch output
    r2 = r2_ref[...]
    cr = cr_ref[...]
    ci = ci_ref[...]
    wr = wr_ref[...]
    wi = wi_ref[...]

    fp = wr.shape[0]
    h = g_ref.shape[1]
    s = cr.shape[0]
    bt = xm_ref.shape[0]

    # Hoist the LN affine broadcast out of the per-row loop (not CSE'd by JAX).
    g = jnp.broadcast_to(g_ref[...], (s, h))
    beta = jnp.broadcast_to(b_ref[...], (s, h))

    def layer_norm(z):
        u = jnp.mean(z, axis=-1, keepdims=True)
        d = z - u
        v = jnp.mean(d * d, axis=-1, keepdims=True)
        return d * lax.rsqrt(v + EPS)         # rsqrt -> single EUP op

    def body(row, carry):
        xm = xm_ref[row]                                  # (S, H) f32
        xc = xc_ref[row]                                  # (S, H) f32
        # merge mean|cov along hidden in VMEM only -> one (S, 2H) MXU RHS per stage.
        # (Sub-128 lane concat/slice when H < 128 is masked-op overhead only; for
        #  H >= 128 it is free.)
        x = jnp.concatenate([xm, xc], axis=-1)            # (S, 2H) f32, kept for residual
        x16 = x.astype(jnp.bfloat16)

        # rfft along seq (ortho) for both branches at once: (2Fp, S) @ (S, 2H)
        xf = jnp.dot(r2, x16, preferred_element_type=jnp.float32)   # (2Fp, 2H) f32
        xr = xf[:fp]                                      # (Fp, 2H) real part
        xi = xf[fp:]                                      # (Fp, 2H) imag part

        # learned complex filter, elementwise in f32
        yr = (xr * wr - xi * wi).astype(jnp.bfloat16)
        yi = (xr * wi + xi * wr).astype(jnp.bfloat16)

        # irfft along seq (ortho), split K-halves (no concat materialization):
        y = (jnp.dot(cr, yr, preferred_element_type=jnp.float32) +
             jnp.dot(ci, yi, preferred_element_type=jnp.float32))    # (S, 2H) f32

        # TODO(synk): out_dropout is identity in eval mode; training-mode dropout not implemented.
        z = y + x                                         # residual, f32

        om_ref[row] = g * layer_norm(z[:, :h]) + beta
        oc_ref[row] = g * layer_norm(z[:, h:]) + beta
        return carry

    lax.fori_loop(0, bt, body, 0, unroll=min(bt, 2))


@functools.lru_cache(maxsize=None)
def _dft_bases(seq_len: int, f_pad: int):
    """Ortho rfft/irfft along seq as real matrices, zero-padded to f_pad frequencies.
    Returns (r2, cr, ci) with r2 = [Re; Im] stacked (2*f_pad, S), cr/ci (S, f_pad).
    Built once with numpy (not traced into every forward)."""
    f = seq_len // 2 + 1

    eye_s = np.eye(seq_len, dtype=np.float64)
    r = np.fft.rfft(eye_s, axis=0, norm="ortho")                    # (F, S) complex
    r2 = np.zeros((2 * f_pad, seq_len), dtype=np.float32)
    r2[:f] = r.real
    r2[f_pad:f_pad + f] = r.imag

    eye_f = np.eye(f, dtype=np.complex128)
    cr_full = np.fft.irfft(eye_f, n=seq_len, axis=0, norm="ortho")       # (S, F)
    ci_full = np.fft.irfft(1j * eye_f, n=seq_len, axis=0, norm="ortho")  # (S, F)
    cr = np.zeros((seq_len, f_pad), dtype=np.float32)
    ci = np.zeros((seq_len, f_pad), dtype=np.float32)
    cr[:, :f] = cr_full
    ci[:, :f] = ci_full

    return (jnp.asarray(r2, dtype=jnp.bfloat16),
            jnp.asarray(cr, dtype=jnp.bfloat16),
            jnp.asarray(ci, dtype=jnp.bfloat16))


def _tpu_vmem_capacity():
    try:
        return int(pltpu.get_tpu_info().vmem_capacity_bytes)
    except Exception:
        return 128 << 20   # v5e / v6e default


def _pick_batch_block(batch, seq_len, hidden, f_pad, vmem_cap):
    """Largest batch block whose double-buffered in+out f32 blocks (plus constants and
    per-row temporaries) fit the generation-aware VMEM budget."""
    h2 = 2 * hidden
    # constant operands x2 pipeline buffers: bf16 DFT bases + f32 filter weights + LN affine
    const_bytes = 2 * ((2 * f_pad * seq_len + 2 * seq_len * f_pad) * 2
                       + 2 * f_pad * h2 * 4 + 2 * hidden * 4)
    # per-row loop temporaries (xf, yr/yi, y, z, x16), single live copy
    row_scratch = 2 * f_pad * h2 * 4 + 2 * f_pad * h2 * 2 + 3 * seq_len * h2 * 4
    # per batch row: (2 inputs + 2 outputs) f32, double buffered
    per_row = 2 * 4 * seq_len * hidden * 4
    # generation-aware budget: ~48 MiB of blocks on 128 MiB parts (v5e/v6e),
    # <= half of VMEM on v7x (64 MiB per TensorCore).
    budget = min(vmem_cap // 2, 48 << 20)
    avail = max(budget - const_bytes - row_scratch, per_row)
    bt = max(1, min(batch, avail // per_row))

    # Only 2-TensorCore parts (v7x, 64 MiB VMEM signature) need >= 2 parallel grid steps;
    # on single-core v5e/v6e keep the largest block that fits.
    two_cores = vmem_cap <= (64 << 20)
    if two_cores and batch >= 2:
        bt = max(1, min(bt, batch // 2))
    # Blocks must divide the batch (odd/prime batches degrade toward bt=1; pad the batch
    # upstream if that matters).
    while batch % bt:
        bt -= 1
    # TODO(synk): for batch == 1 on v7x a second parallel grid axis would be needed to
    # occupy the second TensorCore; not implemented (LN couples the full hidden axis).

    vmem_limit = int(min(vmem_cap * 3 // 4, budget + (16 << 20)))
    return bt, vmem_limit


def dist_filter_layer(x_mean, x_cov, mean_cw, cov_cw, ln_w, ln_b):
    """x_mean, x_cov: (B,S,H) f32.  mean_cw/cov_cw: (1, S//2+1, H, 2).  ln_w/ln_b: (H,)."""
    B, S, H = x_mean.shape
    F = S // 2 + 1
    Fp = ((F + 15) // 16) * 16        # 16-aligned (bf16 sublane) frequency count, zero-padded
    H2 = 2 * H

    r2, cr, ci = _dft_bases(S, Fp)

    # merged (mean | cov), zero-padded complex filter weights: real & imag, (Fp, 2H) f32
    wr = jnp.zeros((Fp, H2), jnp.float32)
    wi = jnp.zeros((Fp, H2), jnp.float32)
    wr = wr.at[:F, :H].set(mean_cw[0, :, :, 0]).at[:F, H:].set(cov_cw[0, :, :, 0])
    wi = wi.at[:F, :H].set(mean_cw[0, :, :, 1]).at[:F, H:].set(cov_cw[0, :, :, 1])

    g = ln_w.astype(jnp.float32).reshape(1, H)
    b = ln_b.astype(jnp.float32).reshape(1, H)

    vmem_cap = _tpu_vmem_capacity()
    bt, vmem_limit = _pick_batch_block(B, S, H, Fp, vmem_cap)
    grid = (B // bt,)

    batched = pl.BlockSpec((bt, S, H), lambda i: (i, 0, 0))
    const2d = lambda shp: pl.BlockSpec(shp, lambda i: (0, 0))

    # advisory cost for the XLA scheduler
    flops = int(16 * B * Fp * S * H)                      # two MXU stages, merged mean|cov
    bytes_accessed = int(4 * B * S * H * 4                # 2 inputs + 2 outputs, f32
                         + (r2.size + cr.size + ci.size) * 2
                         + (wr.size + wi.size) * 4 + (g.size + b.size) * 4)

    out_mean, out_cov = pl.pallas_call(
        _dist_filter_kernel,
        out_shape=(jax.ShapeDtypeStruct((B, S, H), jnp.float32),
                   jax.ShapeDtypeStruct((B, S, H), jnp.float32)),
        grid_spec=pltpu.PrefetchScalarGridSpec(
            num_scalar_prefetch=0,
            grid=grid,
            in_specs=[
                batched,                 # x_mean block
                batched,                 # x_cov block
                const2d((2 * Fp, S)),    # stacked rfft basis (bf16)
                const2d((S, Fp)),        # irfft basis, real (bf16)
                const2d((S, Fp)),        # irfft basis, imag (bf16)
                const2d((Fp, H2)),       # filter weight, real
                const2d((Fp, H2)),       # filter weight, imag
                const2d((1, H)),         # LN weight
                const2d((1, H)),         # LN bias
            ],
            out_specs=[batched, batched],
        ),
        compiler_params=pltpu.CompilerParams(
            dimension_semantics=("parallel",),
            vmem_limit_bytes=vmem_limit),
        cost_estimate=pl.CostEstimate(flops=flops,
                                      transcendentals=int(2 * B * S),
                                      bytes_accessed=bytes_accessed),
    )(x_mean.astype(jnp.float32), x_cov.astype(jnp.float32),
      r2, cr, ci, wr, wi, g, b)

    return out_mean, out_cov


def _reference(x_mean, x_cov, mean_cw, cov_cw, ln_w, ln_b):
    def ln(x):
        u = jnp.mean(x, axis=-1, keepdims=True)
        s = jnp.mean((x - u) ** 2, axis=-1, keepdims=True)
        return ln_w * ((x - u) / jnp.sqrt(s + EPS)) + ln_b

    def branch(x, cw):
        S = x.shape[1]
        w = cw[..., 0] + 1j * cw[..., 1]              # (1, F, H)
        X = jnp.fft.rfft(x, axis=1, norm="ortho") * w
        y = jnp.fft.irfft(X, n=S, axis=1, norm="ortho")
        return ln(y + x)

    return branch(x_mean, mean_cw), branch(x_cov, cov_cw)


if __name__ == "__main__":
    B, S, H = 2, 8, 32          # batch, max_seq_length, hidden_size
    F = S // 2 + 1

    key = jax.random.PRNGKey(0)
    k1, k2, k3, k4 = jax.random.split(key, 4)

    x_mean = jax.random.normal(k1, (B, S, H), dtype=jnp.float32)
    x_cov = jax.random.normal(k2, (B, S, H), dtype=jnp.float32)

    # deterministic parameter init (matches torch.randn(...)*0.02 shape-wise)
    mean_cw = jax.random.normal(k3, (1, F, H, 2), dtype=jnp.float32) * 0.02
    cov_cw = jax.random.normal(k4, (1, F, H, 2), dtype=jnp.float32) * 0.02
    ln_w = jnp.ones((H,), dtype=jnp.float32)
    ln_b = jnp.zeros((H,), dtype=jnp.float32)

    out_mean, out_cov = dist_filter_layer(x_mean, x_cov, mean_cw, cov_cw, ln_w, ln_b)
    jax.block_until_ready((out_mean, out_cov))

    ref_mean, ref_cov = _reference(x_mean, x_cov, mean_cw, cov_cw, ln_w, ln_b)
    # tolerance relaxed because DFT-as-matmul operands run in bf16 on the MXU
    assert jnp.allclose(out_mean, ref_mean, atol=1e-2, rtol=1e-2)
    assert jnp.allclose(out_cov, ref_cov, atol=1e-2, rtol=1e-2)

    print("KERNEL_OK")
</pallas_src>

<mosaic_0001>
module attributes {stable_mosaic.version = 11 : i64} {
  func.func @_dist_filter_kernel(%arg0: i32, %arg1: memref<2x8x32xf32, #tpu.memory_space<vmem>>, %arg2: memref<2x8x32xf32, #tpu.memory_space<vmem>>, %arg3: memref<32x8xbf16, #tpu.memory_space<vmem>>, %arg4: memref<8x16xbf16, #tpu.memory_space<vmem>>, %arg5: memref<8x16xbf16, #tpu.memory_space<vmem>>, %arg6: memref<16x64xf32, #tpu.memory_space<vmem>>, %arg7: memref<16x64xf32, #tpu.memory_space<vmem>>, %arg8: memref<1x32xf32, #tpu.memory_space<vmem>>, %arg9: memref<1x32xf32, #tpu.memory_space<vmem>>, %arg10: memref<2x8x32xf32, #tpu.memory_space<vmem>>, %arg11: memref<2x8x32xf32, #tpu.memory_space<vmem>>) attributes {dimension_semantics = [#tpu.dimension_semantics<parallel>], iteration_bounds = array<i64: 1>, scalar_prefetch = 0 : i64, scratch_operands = 0 : i64, tpu.core_type = #tpu.core_type<tc>, window_params = [{transform_indices = @transform_0, window_bounds = array<i64: 2, 8, 32>}, {transform_indices = @transform_1, window_bounds = array<i64: 2, 8, 32>}, {pipeline_mode = #tpu.pipeline_mode<synchronous>, transform_indices = @transform_2, window_bounds = array<i64: 32, 8>}, {pipeline_mode = #tpu.pipeline_mode<synchronous>, transform_indices = @transform_3, window_bounds = array<i64: 8, 16>}, {pipeline_mode = #tpu.pipeline_mode<synchronous>, transform_indices = @transform_4, window_bounds = array<i64: 8, 16>}, {pipeline_mode = #tpu.pipeline_mode<synchronous>, transform_indices = @transform_5, window_bounds = array<i64: 16, 64>}, {pipeline_mode = #tpu.pipeline_mode<synchronous>, transform_indices = @transform_6, window_bounds = array<i64: 16, 64>}, {pipeline_mode = #tpu.pipeline_mode<synchronous>, transform_indices = @transform_7, window_bounds = array<i64: 1, 32>}, {pipeline_mode = #tpu.pipeline_mode<synchronous>, transform_indices = @transform_8, window_bounds = array<i64: 1, 32>}, {transform_indices = @transform_9, window_bounds = array<i64: 2, 8, 32>}, {transform_indices = @transform_10, window_bounds = array<i64: 2, 8, 32>}]} {
    %c0 = arith.constant 0 : index
    %c0_0 = arith.constant 0 : index
    %0 = vector.load %arg3[%c0, %c0_0] : memref<32x8xbf16, #tpu.memory_space<vmem>>, vector<32x8xbf16>
    %c0_1 = arith.constant 0 : index
    %c0_2 = arith.constant 0 : index
    %1 = vector.load %arg4[%c0_1, %c0_2] : memref<8x16xbf16, #tpu.memory_space<vmem>>, vector<8x16xbf16>
    %c0_3 = arith.constant 0 : index
    %c0_4 = arith.constant 0 : index
    %2 = vector.load %arg5[%c0_3, %c0_4] : memref<8x16xbf16, #tpu.memory_space<vmem>>, vector<8x16xbf16>
    %c0_5 = arith.constant 0 : index
    %c0_6 = arith.constant 0 : index
    %3 = vector.load %arg6[%c0_5, %c0_6] : memref<16x64xf32, #tpu.memory_space<vmem>>, vector<16x64xf32>
    %c0_7 = arith.constant 0 : index
    %c0_8 = arith.constant 0 : index
    %4 = vector.load %arg7[%c0_7, %c0_8] : memref<16x64xf32, #tpu.memory_space<vmem>>, vector<16x64xf32>
    %c0_9 = arith.constant 0 : index
    %c0_10 = arith.constant 0 : index
    %5 = vector.load %arg8[%c0_9, %c0_10] : memref<1x32xf32, #tpu.memory_space<vmem>>, vector<1x32xf32>
    %6 = vector.shape_cast %5 : vector<1x32xf32> to vector<1x32xf32>
    %7 = vector.broadcast %6 : vector<1x32xf32> to vector<8x32xf32>
    %c0_11 = arith.constant 0 : index
    %c0_12 = arith.constant 0 : index
    %8 = vector.load %arg9[%c0_11, %c0_12] : memref<1x32xf32, #tpu.memory_space<vmem>>, vector<1x32xf32>
    %9 = vector.shape_cast %8 : vector<1x32xf32> to vector<1x32xf32>
    %10 = vector.broadcast %9 : vector<1x32xf32> to vector<8x32xf32>
    %c0_i32 = arith.constant 0 : i32
    %11 = arith.index_cast %c0_i32 : i32 to index
    %c0_13 = arith.constant 0 : index
    %c0_14 = arith.constant 0 : index
    %12 = vector.load %arg1[%11, %c0_13, %c0_14] : memref<2x8x32xf32, #tpu.memory_space<vmem>>, vector<1x8x32xf32>
    %13 = vector.shape_cast %12 : vector<1x8x32xf32> to vector<8x32xf32>
    %14 = arith.index_cast %c0_i32 : i32 to index
    %c0_15 = arith.constant 0 : index
    %c0_16 = arith.constant 0 : index
    %15 = vector.load %arg2[%14, %c0_15, %c0_16] : memref<2x8x32xf32, #tpu.memory_space<vmem>>, vector<1x8x32xf32>
    %16 = vector.shape_cast %15 : vector<1x8x32xf32> to vector<8x32xf32>
    %17 = tpu.concatenate %13, %16 in 1 : vector<8x32xf32>, vector<8x32xf32> -> vector<8x64xf32>
    %18 = arith.truncf %17 : vector<8x64xf32> to vector<8x64xbf16>
    %cst = arith.constant dense<0.000000e+00> : vector<32x64xf32>
    %19 = tpu.matmul %0, %18, %cst {dimension_numbers = #tpu.dot_dimension_numbers<[1], [0], [0], [1], [0, 0, 1, 1], [], []>} : vector<32x8xbf16>, vector<8x64xbf16>, vector<32x64xf32> -> vector<32x64xf32>
    %20 = vector.extract_strided_slice %19 {offsets = [0, 0], sizes = [16, 64], strides = [1, 1]} : vector<32x64xf32> to vector<16x64xf32>
    %21 = vector.extract_strided_slice %19 {offsets = [16, 0], sizes = [16, 64], strides = [1, 1]} : vector<32x64xf32> to vector<16x64xf32>
    %22 = arith.mulf %20, %3 : vector<16x64xf32>
    %23 = arith.mulf %21, %4 : vector<16x64xf32>
    %24 = arith.subf %22, %23 : vector<16x64xf32>
    %25 = arith.truncf %24 : vector<16x64xf32> to vector<16x64xbf16>
    %26 = arith.mulf %20, %4 : vector<16x64xf32>
    %27 = arith.mulf %21, %3 : vector<16x64xf32>
    %28 = arith.addf %26, %27 : vector<16x64xf32>
    %29 = arith.truncf %28 : vector<16x64xf32> to vector<16x64xbf16>
    %cst_17 = arith.constant dense<0.000000e+00> : vector<8x64xf32>
    %30 = tpu.matmul %1, %25, %cst_17 {dimension_numbers = #tpu.dot_dimension_numbers<[1], [0], [0], [1], [0, 0, 1, 1], [], []>} : vector<8x16xbf16>, vector<16x64xbf16>, vector<8x64xf32> -> vector<8x64xf32>
    %cst_18 = arith.constant dense<0.000000e+00> : vector<8x64xf32>
    %31 = tpu.matmul %2, %29, %cst_18 {dimension_numbers = #tpu.dot_dimension_numbers<[1], [0], [0], [1], [0, 0, 1, 1], [], []>} : vector<8x16xbf16>, vector<16x64xbf16>, vector<8x64xf32> -> vector<8x64xf32>
    %32 = arith.addf %30, %31 : vector<8x64xf32>
    %33 = arith.addf %32, %17 : vector<8x64xf32>
    %34 = vector.extract_strided_slice %33 {offsets = [0, 0], sizes = [8, 32], strides = [1, 1]} : vector<8x64xf32> to vector<8x32xf32>
    %cst_19 = arith.constant dense<0.000000e+00> : vector<8xf32>
    %35 = vector.multi_reduction <add>, %34, %cst_19 [1] : vector<8x32xf32> to vector<8xf32>
    %36 = vector.shape_cast %35 : vector<8xf32> to vector<8x1xf32>
    %cst_20 = arith.constant 3.200000e+01 : f32
    %37 = vector.broadcast %cst_20 : f32 to vector<8x1xf32>
    %38 = arith.divf %36, %37 : vector<8x1xf32>
    %39 = vector.broadcast %38 : vector<8x1xf32> to vector<8x32xf32>
    %40 = arith.subf %34, %39 : vector<8x32xf32>
    %41 = arith.mulf %40, %40 : vector<8x32xf32>
    %cst_21 = arith.constant dense<0.000000e+00> : vector<8xf32>
    %42 = vector.multi_reduction <add>, %41, %cst_21 [1] : vector<8x32xf32> to vector<8xf32>
    %43 = vector.shape_cast %42 : vector<8xf32> to vector<8x1xf32>
    %cst_22 = arith.constant 3.200000e+01 : f32
    %44 = vector.broadcast %cst_22 : f32 to vector<8x1xf32>
    %45 = arith.divf %43, %44 : vector<8x1xf32>
    %cst_23 = arith.constant 9.99999996E-13 : f32
    %46 = vector.broadcast %cst_23 : f32 to vector<8x1xf32>
    %47 = arith.addf %45, %46 : vector<8x1xf32>
    %48 = math.rsqrt %47 : vector<8x1xf32>
    %49 = vector.broadcast %48 : vector<8x1xf32> to vector<8x32xf32>
    %50 = arith.mulf %40, %49 : vector<8x32xf32>
    %51 = arith.mulf %7, %50 : vector<8x32xf32>
    %52 = arith.addf %51, %10 : vector<8x32xf32>
    %53 = arith.index_cast %c0_i32 : i32 to index
    %c0_24 = arith.constant 0 : index
    %c0_25 = arith.constant 0 : index
    %54 = vector.load %arg10[%53, %c0_24, %c0_25] : memref<2x8x32xf32, #tpu.memory_space<vmem>>, vector<1x8x32xf32>
    %55 = vector.shape_cast %54 : vector<1x8x32xf32> to vector<8x32xf32>
    %56 = vector.shape_cast %52 : vector<8x32xf32> to vector<1x8x32xf32>
    tpu.vector_store %arg10[%53, %c0_24, %c0_25], %56 {strides = array<i32>} : memref<2x8x32xf32, #tpu.memory_space<vmem>>, vector<1x8x32xf32>,
    %57 = vector.extract_strided_slice %33 {offsets = [0, 32], sizes = [8, 32], strides = [1, 1]} : vector<8x64xf32> to vector<8x32xf32>
    %cst_26 = arith.constant dense<0.000000e+00> : vector<8xf32>
    %58 = vector.multi_reduction <add>, %57, %cst_26 [1] : vector<8x32xf32> to vector<8xf32>
    %59 = vector.shape_cast %58 : vector<8xf32> to vector<8x1xf32>
    %cst_27 = arith.constant 3.200000e+01 : f32
    %60 = vector.broadcast %cst_27 : f32 to vector<8x1xf32>
    %61 = arith.divf %59, %60 : vector<8x1xf32>
    %62 = vector.broadcast %61 : vector<8x1xf32> to vector<8x32xf32>
    %63 = arith.subf %57, %62 : vector<8x32xf32>
    %64 = arith.mulf %63, %63 : vector<8x32xf32>
    %cst_28 = arith.constant dense<0.000000e+00> : vector<8xf32>
    %65 = vector.multi_reduction <add>, %64, %cst_28 [1] : vector<8x32xf32> to vector<8xf32>
    %66 = vector.shape_cast %65 : vector<8xf32> to vector<8x1xf32>
    %cst_29 = arith.constant 3.200000e+01 : f32
    %67 = vector.broadcast %cst_29 : f32 to vector<8x1xf32>
    %68 = arith.divf %66, %67 : vector<8x1xf32>
    %cst_30 = arith.constant 9.99999996E-13 : f32
    %69 = vector.broadcast %cst_30 : f32 to vector<8x1xf32>
    %70 = arith.addf %68, %69 : vector<8x1xf32>
    %71 = math.rsqrt %70 : vector<8x1xf32>
    %72 = vector.broadcast %71 : vector<8x1xf32> to vector<8x32xf32>
    %73 = arith.mulf %63, %72 : vector<8x32xf32>
    %74 = arith.mulf %7, %73 : vector<8x32xf32>
    %75 = arith.addf %74, %10 : vector<8x32xf32>
    %76 = arith.index_cast %c0_i32 : i32 to index
    %c0_31 = arith.constant 0 : index
    %c0_32 = arith.constant 0 : index
    %77 = vector.load %arg11[%76, %c0_31, %c0_32] : memref<2x8x32xf32, #tpu.memory_space<vmem>>, vector<1x8x32xf32>
    %78 = vector.shape_cast %77 : vector<1x8x32xf32> to vector<8x32xf32>
    %79 = vector.shape_cast %75 : vector<8x32xf32> to vector<1x8x32xf32>
    tpu.vector_store %arg11[%76, %c0_31, %c0_32], %79 {strides = array<i32>} : memref<2x8x32xf32, #tpu.memory_space<vmem>>, vector<1x8x32xf32>,
    %c1_i32 = arith.constant 1 : i32
    %80 = arith.index_cast %c1_i32 : i32 to index
    %c0_33 = arith.constant 0 : index
    %c0_34 = arith.constant 0 : index
    %81 = vector.load %arg1[%80, %c0_33, %c0_34] : memref<2x8x32xf32, #tpu.memory_space<vmem>>, vector<1x8x32xf32>
    %82 = vector.shape_cast %81 : vector<1x8x32xf32> to vector<8x32xf32>
    %83 = arith.index_cast %c1_i32 : i32 to index
    %c0_35 = arith.constant 0 : index
    %c0_36 = arith.constant 0 : index
    %84 = vector.load %arg2[%83, %c0_35, %c0_36] : memref<2x8x32xf32, #tpu.memory_space<vmem>>, vector<1x8x32xf32>
    %85 = vector.shape_cast %84 : vector<1x8x32xf32> to vector<8x32xf32>
    %86 = tpu.concatenate %82, %85 in 1 : vector<8x32xf32>, vector<8x32xf32> -> vector<8x64xf32>
    %87 = arith.truncf %86 : vector<8x64xf32> to vector<8x64xbf16>
    %cst_37 = arith.constant dense<0.000000e+00> : vector<32x64xf32>
    %88 = tpu.matmul %0, %87, %cst_37 {dimension_numbers = #tpu.dot_dimension_numbers<[1], [0], [0], [1], [0, 0, 1, 1], [], []>} : vector<32x8xbf16>, vector<8x64xbf16>, vector<32x64xf32> -> vector<32x64xf32>
    %89 = vector.extract_strided_slice %88 {offsets = [0, 0], sizes = [16, 64], strides = [1, 1]} : vector<32x64xf32> to vector<16x64xf32>
    %90 = vector.extract_strided_slice %88 {offsets = [16, 0], sizes = [16, 64], strides = [1, 1]} : vector<32x64xf32> to vector<16x64xf32>
    %91 = arith.mulf %89, %3 : vector<16x64xf32>
    %92 = arith.mulf %90, %4 : vector<16x64xf32>
    %93 = arith.subf %91, %92 : vector<16x64xf32>
    %94 = arith.truncf %93 : vector<16x64xf32> to vector<16x64xbf16>
    %95 = arith.mulf %89, %4 : vector<16x64xf32>
    %96 = arith.mulf %90, %3 : vector<16x64xf32>
    %97 = arith.addf %95, %96 : vector<16x64xf32>
    %98 = arith.truncf %97 : vector<16x64xf32> to vector<16x64xbf16>
    %cst_38 = arith.constant dense<0.000000e+00> : vector<8x64xf32>
    %99 = tpu.matmul %1, %94, %cst_38 {dimension_numbers = #tpu.dot_dimension_numbers<[1], [0], [0], [1], [0, 0, 1, 1], [], []>} : vector<8x16xbf16>, vector<16x64xbf16>, vector<8x64xf32> -> vector<8x64xf32>
    %cst_39 = arith.constant dense<0.000000e+00> : vector<8x64xf32>
    %100 = tpu.matmul %2, %98, %cst_39 {dimension_numbers = #tpu.dot_dimension_numbers<[1], [0], [0], [1], [0, 0, 1, 1], [], []>} : vector<8x16xbf16>, vector<16x64xbf16>, vector<8x64xf32> -> vector<8x64xf32>
    %101 = arith.addf %99, %100 : vector<8x64xf32>
    %102 = arith.addf %101, %86 : vector<8x64xf32>
    %103 = vector.extract_strided_slice %102 {offsets = [0, 0], sizes = [8, 32], strides = [1, 1]} : vector<8x64xf32> to vector<8x32xf32>
    %cst_40 = arith.constant dense<0.000000e+00> : vector<8xf32>
    %104 = vector.multi_reduction <add>, %103, %cst_40 [1] : vector<8x32xf32> to vector<8xf32>
    %105 = vector.shape_cast %104 : vector<8xf32> to vector<8x1xf32>
    %cst_41 = arith.constant 3.200000e+01 : f32
    %106 = vector.broadcast %cst_41 : f32 to vector<8x1xf32>
    %107 = arith.divf %105, %106 : vector<8x1xf32>
    %108 = vector.broadcast %107 : vector<8x1xf32> to vector<8x32xf32>
    %109 = arith.subf %103, %108 : vector<8x32xf32>
    %110 = arith.mulf %109, %109 : vector<8x32xf32>
    %cst_42 = arith.constant dense<0.000000e+00> : vector<8xf32>
    %111 = vector.multi_reduction <add>, %110, %cst_42 [1] : vector<8x32xf32> to vector<8xf32>
    %112 = vector.shape_cast %111 : vector<8xf32> to vector<8x1xf32>
    %cst_43 = arith.constant 3.200000e+01 : f32
    %113 = vector.broadcast %cst_43 : f32 to vector<8x1xf32>
    %114 = arith.divf %112, %113 : vector<8x1xf32>
    %cst_44 = arith.constant 9.99999996E-13 : f32
    %115 = vector.broadcast %cst_44 : f32 to vector<8x1xf32>
    %116 = arith.addf %114, %115 : vector<8x1xf32>
    %117 = math.rsqrt %116 : vector<8x1xf32>
    %118 = vector.broadcast %117 : vector<8x1xf32> to vector<8x32xf32>
    %119 = arith.mulf %109, %118 : vector<8x32xf32>
    %120 = arith.mulf %7, %119 : vector<8x32xf32>
    %121 = arith.addf %120, %10 : vector<8x32xf32>
    %122 = arith.index_cast %c1_i32 : i32 to index
    %c0_45 = arith.constant 0 : index
    %c0_46 = arith.constant 0 : index
    %123 = vector.load %arg10[%122, %c0_45, %c0_46] : memref<2x8x32xf32, #tpu.memory_space<vmem>>, vector<1x8x32xf32>
    %124 = vector.shape_cast %123 : vector<1x8x32xf32> to vector<8x32xf32>
    %125 = vector.shape_cast %121 : vector<8x32xf32> to vector<1x8x32xf32>
    tpu.vector_store %arg10[%122, %c0_45, %c0_46], %125 {strides = array<i32>} : memref<2x8x32xf32, #tpu.memory_space<vmem>>, vector<1x8x32xf32>,
    %126 = vector.extract_strided_slice %102 {offsets = [0, 32], sizes = [8, 32], strides = [1, 1]} : vector<8x64xf32> to vector<8x32xf32>
    %cst_47 = arith.constant dense<0.000000e+00> : vector<8xf32>
    %127 = vector.multi_reduction <add>, %126, %cst_47 [1] : vector<8x32xf32> to vector<8xf32>
    %128 = vector.shape_cast %127 : vector<8xf32> to vector<8x1xf32>
    %cst_48 = arith.constant 3.200000e+01 : f32
    %129 = vector.broadcast %cst_48 : f32 to vector<8x1xf32>
    %130 = arith.divf %128, %129 : vector<8x1xf32>
    %131 = vector.broadcast %130 : vector<8x1xf32> to vector<8x32xf32>
    %132 = arith.subf %126, %131 : vector<8x32xf32>
    %133 = arith.mulf %132, %132 : vector<8x32xf32>
    %cst_49 = arith.constant dense<0.000000e+00> : vector<8xf32>
    %134 = vector.multi_reduction <add>, %133, %cst_49 [1] : vector<8x32xf32> to vector<8xf32>
    %135 = vector.shape_cast %134 : vector<8xf32> to vector<8x1xf32>
    %cst_50 = arith.constant 3.200000e+01 : f32
    %136 = vector.broadcast %cst_50 : f32 to vector<8x1xf32>
    %137 = arith.divf %135, %136 : vector<8x1xf32>
    %cst_51 = arith.constant 9.99999996E-13 : f32
    %138 = vector.broadcast %cst_51 : f32 to vector<8x1xf32>
    %139 = arith.addf %137, %138 : vector<8x1xf32>
    %140 = math.rsqrt %139 : vector<8x1xf32>
    %141 = vector.broadcast %140 : vector<8x1xf32> to vector<8x32xf32>
    %142 = arith.mulf %132, %141 : vector<8x32xf32>
    %143 = arith.mulf %7, %142 : vector<8x32xf32>
    %144 = arith.addf %143, %10 : vector<8x32xf32>
    %145 = arith.index_cast %c1_i32 : i32 to index
    %c0_52 = arith.constant 0 : index
    %c0_53 = arith.constant 0 : index
    %146 = vector.load %arg11[%145, %c0_52, %c0_53] : memref<2x8x32xf32, #tpu.memory_space<vmem>>, vector<1x8x32xf32>
    %147 = vector.shape_cast %146 : vector<1x8x32xf32> to vector<8x32xf32>
    %148 = vector.shape_cast %144 : vector<8x32xf32> to vector<1x8x32xf32>
    tpu.vector_store %arg11[%145, %c0_52, %c0_53], %148 {strides = array<i32>} : memref<2x8x32xf32, #tpu.memory_space<vmem>>, vector<1x8x32xf32>,
    %c2_i32 = arith.constant 2 : i32
    return
  }
  func.func @transform_0(%arg0: i32) -> (i32, i32, i32) {
    %c0_i32 = arith.constant 0 : i32
    %c0_i32_0 = arith.constant 0 : i32
    %c0_i32_1 = arith.constant 0 : i32
    return %arg0, %c0_i32, %c0_i32_0 : i32, i32, i32
  }
  func.func @transform_1(%arg0: i32) -> (i32, i32, i32) {
    %c0_i32 = arith.constant 0 : i32
    %c0_i32_0 = arith.constant 0 : i32
    %c0_i32_1 = arith.constant 0 : i32
    return %arg0, %c0_i32, %c0_i32_0 : i32, i32, i32
  }
  func.func @transform_2(%arg0: i32) -> (i32, i32) {
    %c0_i32 = arith.constant 0 : i32
    %c0_i32_0 = arith.constant 0 : i32
    %c0_i32_1 = arith.constant 0 : i32
    return %c0_i32, %c0_i32_0 : i32, i32
  }
  func.func @transform_3(%arg0: i32) -> (i32, i32) {
    %c0_i32 = arith.constant 0 : i32
    %c0_i32_0 = arith.constant 0 : i32
    %c0_i32_1 = arith.constant 0 : i32
    return %c0_i32, %c0_i32_0 : i32, i32
  }
  func.func @transform_4(%arg0: i32) -> (i32, i32) {
    %c0_i32 = arith.constant 0 : i32
    %c0_i32_0 = arith.constant 0 : i32
    %c0_i32_1 = arith.constant 0 : i32
    return %c0_i32, %c0_i32_0 : i32, i32
  }
  func.func @transform_5(%arg0: i32) -> (i32, i32) {
    %c0_i32 = arith.constant 0 : i32
    %c0_i32_0 = arith.constant 0 : i32
    %c0_i32_1 = arith.constant 0 : i32
    return %c0_i32, %c0_i32_0 : i32, i32
  }
  func.func @transform_6(%arg0: i32) -> (i32, i32) {
    %c0_i32 = arith.constant 0 : i32
    %c0_i32_0 = arith.constant 0 : i32
    %c0_i32_1 = arith.constant 0 : i32
    return %c0_i32, %c0_i32_0 : i32, i32
  }
  func.func @transform_7(%arg0: i32) -> (i32, i32) {
    %c0_i32 = arith.constant 0 : i32
    %c0_i32_0 = arith.constant 0 : i32
    %c0_i32_1 = arith.constant 0 : i32
    return %c0_i32, %c0_i32_0 : i32, i32
  }
  func.func @transform_8(%arg0: i32) -> (i32, i32) {
    %c0_i32 = arith.constant 0 : i32
    %c0_i32_0 = arith.constant 0 : i32
    %c0_i32_1 = arith.constant 0 : i32
    return %c0_i32, %c0_i32_0 : i32, i32
  }
  func.func @transform_9(%arg0: i32) -> (i32, i32, i32) {
    %c0_i32 = arith.constant 0 : i32
    %c0_i32_0 = arith.constant 0 : i32
    %c0_i32_1 = arith.constant 0 : i32
    return %arg0, %c0_i32, %c0_i32_0 : i32, i32, i32
  }
  func.func @transform_10(%arg0: i32) -> (i32, i32, i32) {
    %c0_i32 = arith.constant 0 : i32
    %c0_i32_0 = arith.constant 0 : i32
    %c0_i32_1 = arith.constant 0 : i32
    return %arg0, %c0_i32, %c0_i32_0 : i32, i32, i32
  }
}

</mosaic_0001>

<bundles_post_ra>
// kernel: tpu_custom_call.1
= control target key start
LH: loop header
LB: loop body
LE: loop exit
PB: predicated region body
PF: predicated region fallthrough
CT: control target
= control target key end

     0   :  { %16 = vsyncpa [#allocation3], 0  ;;  %s1286_s0 = inlined_call_operand.hbm [shape: f32[2,8,32], index: 0, kind: input, shape index: {}]   ;;  %s1287_s1 = inlined_call_operand.hbm [shape: f32[2,8,32], index: 1, kind: input, shape index: {}]   ;;  %s1288_s2 = inlined_call_operand.hbm [shape: bf16[32,8], index: 2, kind: input, shape index: {}]   ;;  %s1289_s3 = inlined_call_operand.hbm [shape: bf16[8,16], index: 3, kind: input, shape index: {}]   ;;  %s1290_s4 = inlined_call_operand.hbm [shape: bf16[8,16], index: 4, kind: input, shape index: {}]   ;;  %s1291_s5 = inlined_call_operand.hbm [shape: f32[16,64], index: 5, kind: input, shape index: {}]   ;;  %s1292_s6 = inlined_call_operand.hbm [shape: f32[16,64], index: 6, kind: input, shape index: {}]   ;;  %s1293_s7 = inlined_call_operand.hbm [shape: f32[1,32], index: 7, kind: input, shape index: {}]   ;;  %s1294_s8 = inlined_call_operand.hbm [shape: f32[1,32], index: 8, kind: input, shape index: {}]   ;;  %s1295_s9 = inlined_call_operand.hbm [shape: f32[2,8,32], index: 9, kind: output, shape index: {0}]   ;;  %s1296_s10 = inlined_call_operand.hbm [shape: f32[2,8,32], index: 10, kind: output, shape index: {1}]  }
   0x1   :  { %17 = vsyncpa [#allocation6], 0 }
   0x2   :  { %18 = vsyncpa [#allocation9], 0 }
   0x3   :  { %19 = vsyncpa [#allocation12], 0 }
   0x4   :  { %20 = vsyncpa [#allocation15], 0 }
   0x5   :  { %21 = vsyncpa [#allocation4], 0 }
   0x6   :  { %22 = vsyncpa [#allocation19], 0  ;;  %s990_s13 = smov [#allocation5]   ;;  %s991_s15 = smov [#allocation8]  }
   0x7   :  { %s40_s14 = sshll.u32 %s990_s13, 4  ;;  %s65_s16 = sshll.u32 %s991_s15, 4  ;;  %s41_s14 = int_to_ptr.vmem [resolvable:$true] %s40_s14  ;;  %s66_s16 = int_to_ptr.vmem [resolvable:$true] %s65_s16 }
   0x8   :  { %s734_s19 = scalar_lea.hbm %s1287_s1, 256 }
   0x9   :  { %p735_p0 = scmp.ne.s32.totalorder %s1287_s1, %s734_s19  ;;  %p738_p1 = scmp.lt.u32.totalorder %s734_s19, %s1287_s1 }
   0xb   :  { %p740_p2 = pnand %p738_p1, %p735_p0 }
   0xd   :  { %743 = shalt.err (!%p740_p2)
}
   0xe   :  { %s744_s24 = scalar_lea.vmem %s41_s14, 256  ;;  %p749_p4 = scmp.lt.s32.totalorder %s41_s14, %s41_s14 }
   0xf   :  { %p745_p3 = scmp.ne.s32.totalorder %s41_s14, %s744_s24  ;;  %p750_p5 = scmp.lt.s32.totalorder %s744_s24, %s744_s24 }
  0x11   :  { %p751_p6 = por %p750_p5, %p749_p4 }
  0x13   :  { %p752_p7 = pnand %p751_p6, %p745_p3 }
  0x15   :  { %755 = shalt.err (!%p752_p7)
}
  0x16   :  { %s992_s25 = smov 128   ;;  %s993_s26 = smov 8  }
  0x17   :  { %46 = dma.hbm_to_vmem [thread:$0]  %s1287_s1, 256, %s41_s14, [#allocation6], %s992_s25, %s992_s25, %s993_s26  }
  0x18   :  { %s756_s11 = scalar_lea.hbm %s1289_s3, 64 }
  0x19   :  { %p757_p8 = scmp.ne.s32.totalorder %s1289_s3, %s756_s11  ;;  %p760_p9 = scmp.lt.u32.totalorder %s756_s11, %s1289_s3 }
  0x1b   :  { %p762_p10 = pnand %p760_p9, %p757_p8 }
  0x1d   :  { %765 = shalt.err (!%p762_p10)
}
  0x1e   :  { %s766_s18 = scalar_lea.vmem %s66_s16, 64  ;;  %p771_p12 = scmp.lt.s32.totalorder %s66_s16, %s66_s16 }
  0x1f   :  { %p767_p11 = scmp.ne.s32.totalorder %s66_s16, %s766_s18  ;;  %p772_p13 = scmp.lt.s32.totalorder %s766_s18, %s766_s18 }
  0x21   :  { %p773_p0 = por %p772_p13, %p771_p12 }
  0x23   :  { %p774_p1 = pnand %p773_p0, %p767_p11 }
  0x25   :  { %777 = shalt.err (!%p774_p1)
}
  0x26   :  { %68 = dma.hbm_to_vmem [thread:$0]  %s1289_s3, 64, %s66_s16, [#allocation9]  }
  0x27   :  { %s994_s19 = smov [#allocation11]   ;;  %s995_s21 = smov [#allocation14]  }
  0x28   :  { %s84_s20 = sshll.u32 %s994_s19, 4  ;;  %s109_s22 = sshll.u32 %s995_s21, 4  ;;  %s85_s20 = int_to_ptr.vmem [resolvable:$true] %s84_s20  ;;  %s110_s22 = int_to_ptr.vmem [resolvable:$true] %s109_s22 }
  0x29   :  { %s778_s27 = scalar_lea.hbm %s1291_s5, 256 }
  0x2a   :  { %p779_p2 = scmp.ne.s32.totalorder %s1291_s5, %s778_s27  ;;  %p782_p3 = scmp.lt.u32.totalorder %s778_s27, %s1291_s5 }
  0x2c   :  { %p784_p4 = pnand %p782_p3, %p779_p2 }
  0x2e   :  { %787 = shalt.err (!%p784_p4)
}
  0x2f   :  { %s788_s3 = scalar_lea.vmem %s85_s20, 256  ;;  %p793_p6 = scmp.lt.s32.totalorder %s85_s20, %s85_s20 }
  0x30   :  { %p789_p5 = scmp.ne.s32.totalorder %s85_s20, %s788_s3  ;;  %p794_p7 = scmp.lt.s32.totalorder %s788_s3, %s788_s3 }
  0x32   :  { %p795_p8 = por %p794_p7, %p793_p6 }
  0x34   :  { %p796_p9 = pnand %p795_p8, %p789_p5 }
  0x36   :  { %799 = shalt.err (!%p796_p9)
}
  0x37   :  { %90 = dma.hbm_to_vmem [thread:$0]  %s1291_s5, 256, %s85_s20, [#allocation12], %s992_s25, %s992_s25, %s993_s26  }
  0x38   :  { %s800_s17 = scalar_lea.hbm %s1293_s7, 16 }
  0x39   :  { %p801_p10 = scmp.ne.s32.totalorder %s1293_s7, %s800_s17  ;;  %p804_p11 = scmp.lt.u32.totalorder %s800_s17, %s1293_s7 }
  0x3b   :  { %p806_p12 = pnand %p804_p11, %p801_p10 }
  0x3d   :  { %809 = shalt.err (!%p806_p12)
}
  0x3e   :  { %s810_s21 = scalar_lea.vmem %s110_s22, 16  ;;  %s814_s23 = scalar_lea.vmem %s110_s22, 32 }
  0x3f   :  { %p811_p13 = scmp.ne.s32.totalorder %s110_s22, %s810_s21  ;;  %p815_p0 = scmp.lt.s32.totalorder %s110_s22, %s110_s22 }
  0x40   :  { %p816_p1 = scmp.lt.s32.totalorder %s814_s23, %s810_s21 }
  0x42   :  { %p817_p2 = por %p816_p1, %p815_p0 }
  0x44   :  { %p818_p3 = pnand %p817_p2, %p811_p13 }
  0x46   :  { %821 = shalt.err (!%p818_p3)
}
  0x47   :  { %112 = dma.hbm_to_vmem [thread:$0]  %s1293_s7, 16, %s110_s22, [#allocation15]  }
  0x48   :  { %s996_s24 = smov [#allocation2]   ;;  %s997_s28 = smov [#allocation7]  }
  0x49   :  { %s28_s27 = sshll.u32 %s996_s24, 4  ;;  %s52_s29 = sshll.u32 %s997_s28, 4  ;;  %s29_s27 = int_to_ptr.vmem [resolvable:$true] %s28_s27  ;;  %s1118_s29 = int_to_ptr.vmem [resolvable:$true] %s52_s29 }
  0x4a   :  { %s822_s3 = scalar_lea.hbm %s1286_s0, 256 }
  0x4b   :  { %p823_p4 = scmp.ne.s32.totalorder %s1286_s0, %s822_s3  ;;  %p826_p5 = scmp.lt.u32.totalorder %s822_s3, %s1286_s0 }
  0x4d   :  { %p828_p6 = pnand %p826_p5, %p823_p4 }
  0x4f   :  { %831 = shalt.err (!%p828_p6)
}
  0x50   :  { %s832_s7 = scalar_lea.vmem %s29_s27, 256  ;;  %p837_p8 = scmp.lt.s32.totalorder %s29_s27, %s29_s27 }
  0x51   :  { %p833_p7 = scmp.ne.s32.totalorder %s29_s27, %s832_s7  ;;  %p838_p9 = scmp.lt.s32.totalorder %s832_s7, %s832_s7 }
  0x53   :  { %p839_p10 = por %p838_p9, %p837_p8 }
  0x55   :  { %p840_p11 = pnand %p839_p10, %p833_p7 }
  0x57   :  { %843 = shalt.err (!%p840_p11)
}
  0x58   :  { %34 = dma.hbm_to_vmem [thread:$0]  %s1286_s0, 256, %s29_s27, [#allocation3], %s992_s25, %s992_s25, %s993_s26  }
  0x59   :  { %s844_s14 = scalar_lea.hbm %s1288_s2, 256 }
  0x5a   :  { %p845_p12 = scmp.ne.s32.totalorder %s1288_s2, %s844_s14  ;;  %p848_p13 = scmp.lt.u32.totalorder %s844_s14, %s1288_s2 }
  0x5c   :  { %p850_p0 = pnand %p848_p13, %p845_p12 }
  0x5e   :  { %853 = shalt.err (!%p850_p0)
}
  0x5f   :  { %s854_s20 = scalar_lea.vmem %s1118_s29, 256  ;;  %p859_p2 = scmp.lt.s32.totalorder %s1118_s29, %s1118_s29 }
  0x60   :  { %p855_p1 = scmp.ne.s32.totalorder %s1118_s29, %s854_s20  ;;  %p860_p3 = scmp.lt.s32.totalorder %s854_s20, %s854_s20 }
  0x62   :  { %p861_p4 = por %p860_p3, %p859_p2 }
  0x64   :  { %p862_p5 = pnand %p861_p4, %p855_p1 }
  0x66   :  { %865 = shalt.err (!%p862_p5)
}
  0x67   :  { %s998_s0 = smov 64   ;;  %s999_s24 = smov 4  }
  0x68   :  { %58 = dma.hbm_to_vmem [thread:$0]  %s1288_s2, 256, %s1118_s29, [#allocation6], %s998_s0, %s998_s0, %s999_s24  }
  0x69   :  { %s1000_s30 = smov [#allocation10]   ;;  %s1001_s3 = smov [#allocation13]  }
  0x6a   :  { %s75_s11 = sshll.u32 %s1000_s30, 4  ;;  %s96_s16 = sshll.u32 %s1001_s3, 4  ;;  %s76_s11 = int_to_ptr.vmem [resolvable:$true] %s75_s11  ;;  %s1152_s16 = int_to_ptr.vmem [resolvable:$true] %s96_s16 }
  0x6b   :  { %s866_s15 = scalar_lea.hbm %s1290_s4, 64 }
  0x6c   :  { %p867_p6 = scmp.ne.s32.totalorder %s1290_s4, %s866_s15  ;;  %p870_p7 = scmp.lt.u32.totalorder %s866_s15, %s1290_s4 }
  0x6e   :  { %p872_p8 = pnand %p870_p7, %p867_p6 }
  0x70   :  { %875 = shalt.err (!%p872_p8)
}
  0x71   :  { %s876_s2 = scalar_lea.vmem %s76_s11, 64  ;;  %p881_p10 = scmp.lt.s32.totalorder %s76_s11, %s76_s11 }
  0x72   :  { %p877_p9 = scmp.ne.s32.totalorder %s76_s11, %s876_s2  ;;  %p882_p11 = scmp.lt.s32.totalorder %s876_s2, %s876_s2 }
  0x74   :  { %p883_p12 = por %p882_p11, %p881_p10 }
  0x76   :  { %p884_p13 = pnand %p883_p12, %p877_p9 }
  0x78   :  { %887 = shalt.err (!%p884_p13)
}
  0x79   :  { %78 = dma.hbm_to_vmem [thread:$0]  %s1290_s4, 64, %s76_s11, [#allocation9]  }
  0x7a   :  { %s888_s21 = scalar_lea.hbm %s1292_s6, 256 }
  0x7b   :  { %p889_p0 = scmp.ne.s32.totalorder %s1292_s6, %s888_s21  ;;  %p892_p1 = scmp.lt.u32.totalorder %s888_s21, %s1292_s6 }
  0x7d   :  { %p894_p2 = pnand %p892_p1, %p889_p0 }
  0x7f   :  { %897 = shalt.err (!%p894_p2)
}
  0x80   :  { %s898_s24 = scalar_lea.vmem %s1152_s16, 256  ;;  %p903_p4 = scmp.lt.s32.totalorder %s1152_s16, %s1152_s16 }
  0x81   :  { %p899_p3 = scmp.ne.s32.totalorder %s1152_s16, %s898_s24  ;;  %p904_p5 = scmp.lt.s32.totalorder %s898_s24, %s898_s24 }
  0x83   :  { %p905_p6 = por %p904_p5, %p903_p4 }
  0x85   :  { %p906_p7 = pnand %p905_p6, %p899_p3 }
  0x87   :  { %909 = shalt.err (!%p906_p7)
}
  0x88   :  { %102 = dma.hbm_to_vmem [thread:$0]  %s1292_s6, 256, %s1152_s16, [#allocation12], %s992_s25, %s992_s25, %s993_s26  }
  0x89   :  { %s1002_s28 = smov [#allocation16]   ;;  %s910_s12 = scalar_lea.hbm %s1294_s8, 16 }
  0x8a   :  { %s119_s30 = sshll.u32 %s1002_s28, 4  ;;  %p911_p8 = scmp.ne.s32.totalorder %s1294_s8, %s910_s12  ;;  %s120_s30 = int_to_ptr.vmem [resolvable:$true] %s119_s30 }
  0x8b   :  { %p914_p9 = scmp.lt.u32.totalorder %s910_s12, %s1294_s8 }
  0x8d   :  { %p916_p10 = pnand %p914_p9, %p911_p8 }
  0x8f   :  { %919 = shalt.err (!%p916_p10)
}
  0x90   :  { %s920_s17 = scalar_lea.vmem %s120_s30, 16  ;;  %s924_s6 = scalar_lea.vmem %s120_s30, 32 }
  0x91   :  { %p921_p11 = scmp.ne.s32.totalorder %s120_s30, %s920_s17  ;;  %p925_p12 = scmp.lt.s32.totalorder %s120_s30, %s120_s30 }
  0x92   :  { %p926_p13 = scmp.lt.s32.totalorder %s924_s6, %s920_s17 }
  0x94   :  { %p927_p0 = por %p926_p13, %p925_p12 }
  0x96   :  { %p928_p1 = pnand %p927_p0, %p921_p11 }
  0x98   :  { %931 = shalt.err (!%p928_p1)
}
  0x99   :  { %122 = dma.hbm_to_vmem [thread:$0]  %s1294_s8, 16, %s120_s30, [#allocation15]  }
  0x9a   :  { %976 = dma.done.wait [#allocation3], 256  }
  0x9b   :  { %977 = vsyncadd [#allocation3], 4294967040 }
  0x9c   :  { %978 = dma.done.wait [#allocation6], 512  }
  0x9d   :  { %979 = vsyncadd [#allocation6], 4294966784 }
  0x9e   :  { %980 = dma.done.wait [#allocation9], 128  }
  0x9f   :  { %981 = vsyncadd [#allocation9], 4294967168 }
  0xa0   :  { %982 = dma.done.wait [#allocation12], 512  }
  0xa1   :  { %983 = vsyncadd [#allocation12], 4294966784 }
  0xa2   :  { %984 = dma.done.wait [#allocation15], 32  }
  0xa3   :  { %985 = vsyncadd [#allocation15], 4294967264  ;;  %v176_v0 = vld [vmem:[#allocation5] sm:$0xff]  ;;  %vm194_vm0 = vcmask 64512   ;;  %s1003_s2 = smov 32   ;;  %v724_v1 = vld [vmem:[#allocation7] sm:$0xff]  }
  0xa4   :  { %178 = vrot.lane.b32.xlu0 %v176_v0, %s1003_s2  ;;  %v404_v2 = vld [vmem:[#allocation5 + $0x8] sm:$0xff]  ;;  %669 = vmatprep.mubr.msk.bf16.mxu0 %vm194_vm0, %v724_v1  ;;  %vm181_vm1 = vcmask 261120   ;;  %v175_v3 = vld [vmem:[#allocation2] sm:$0xff]  ;;  %vm201_vm2 = vcmask 1043456   ;;  %v725_v8 = vld [vmem:[#allocation7 + $0x8] sm:$0xff]   ;;  %v1004_v9 = vmov 0.0  }
  0xa5   :  { %673 = vmatprep.subr.bf16.mxu1 %v1004_v9  ;;  %vm1005_vm3 = vmmov 0   ;;  %v157_v10 = vld [vmem:[#allocation11] sm:$0xff]  ;;  %v159_v11 = vld [vmem:[#allocation13] sm:$0xff]  ;;  %v1209_v13 = vld [vmem:[#allocation11 + $0x8] sm:$0xff]  ;;  %vm268_vm4 = vcmask 130048   ;;  %s1006_s8 = smov 96  }
  0xa6   :  { %675 = vmatprep.mubr.msk.bf16.mxu1 %vm1005_vm3, %v1004_v9  ;;  %v1211_v14 = vld [vmem:[#allocation13 + $0x8] sm:$0xff]  ;;  %v402_v15 = vld [vmem:[#allocation2 + $0x8] sm:$0xff]  ;;  %s1007_s29 = smov [#allocation17]  }
  0xa7   :  { %v156_v36 = vld [vmem:[#allocation10] sm:$0xf]  ;;  %v155_v37 = vld [vmem:[#allocation8] sm:$0xf]  ;;  %s609_s1 = sshll.u32 %s1007_s29, 4  ;;  %s610_s1 = int_to_ptr.vmem [resolvable:$true] %s609_s1 }
  0xa8   :  { %406 = vrot.lane.b32.xlu0 %v404_v2, %s1003_s2  ;;  %s932_s14 = scalar_lea.vmem %s610_s1, 256  ;;  %p937_p3 = scmp.lt.s32.totalorder %s610_s1, %s610_s1 }
  0xa9   :  { %p933_p2 = scmp.ne.s32.totalorder %s610_s1, %s932_s14  ;;  %p938_p4 = scmp.lt.s32.totalorder %s932_s14, %s932_s14 }
  0xab   :  { %p939_p5 = por %p938_p4, %p937_p3 }
  0xad   :  { %p940_p6 = pnand %p939_p5, %p933_p2 }
 0x116   :  { %v179_v4 = vpop.permute.xlu0 %178 }
 0x117   :  { %v1200_v5 = vsel %vm181_vm1, %v175_v3, %v179_v4 }
 0x118   :  { %v183_v6 = vpack.c.bf16 %v1200_v5, %v1200_v5 }
 0x11a   :  { %703 = vmatprep.subr.msk.bf16.mxu0 %vm201_vm2, %v183_v6  ;;  %v203_v7 = vsel %vm201_vm2, %v183_v6, 0  ;;  %v407_v16 = vpop.permute.xlu0 %406 }
 0x11b   :  { %668 = vmatpush3.bf16.msra.mxu0 %v203_v7  ;;  %v1216_v26 = vsel %vm181_vm1, %v402_v15, %v407_v16 }
 0x11c   :  { %679 = vmatprep.subr.bf16.mxu0 %v1004_v9  ;;  %v410_v33 = vpack.c.bf16 %v1216_v26, %v1216_v26 }
 0x11e   :  { %670 = vmatmul.mubr.msk.bf16.vlgmr.msra.gmra.mrb[0].mxu0 %vm194_vm0, %v725_v8  ;;  %v412_v38 = vsel %vm201_vm2, %v410_v33, 0 }
 0x11f   :  { %681 = vmatprep.mubr.msk.bf16.mxu0 %vm1005_vm3, %v1004_v9 }
 0x1f1   :  { %v671_v12 = vpop.f32.mrb[0].mxu0 }
 0x1f2   :  { %v256_v17 = vmul.f32 %v671_v12, %v159_v11  ;;  %v263_v18 = vmul.f32 %v671_v12, %v157_v10  ;;  %v239_v19 = vpop.f32.mrb[1].mxu0 }
 0x1f3   :  { %v254_v20 = vmul.f32 %v239_v19, %v157_v10  ;;  %v261_v21 = vmul.f32 %v239_v19, %v159_v11  ;;  %v672_v22 = vpop.f32.mrb[2].mxu0 }
 0x1f4   :  { %v257_v23 = vmul.f32 %v672_v22, %v1211_v14  ;;  %v264_v24 = vmul.f32 %v672_v22, %v1209_v13  ;;  %v242_v25 = vpop.f32.mrb[3].mxu0 }
 0x1f5   :  { %v258_v27 = vsub.f32 %v254_v20, %v256_v17  ;;  %v255_v28 = vmul.f32 %v242_v25, %v1209_v13  ;;  %v262_v29 = vmul.f32 %v242_v25, %v1211_v14  ;;  %v265_v30 = vadd.f32 %v263_v18, %v261_v21 }
 0x1f7   :  { %v259_v31 = vsub.f32 %v255_v28, %v257_v23  ;;  %v266_v32 = vadd.f32 %v264_v24, %v262_v29 }
 0x1f9   :  { %v260_v34 = vpack.c.bf16 %v259_v31, %v258_v27  ;;  %v267_v35 = vpack.c.bf16 %v266_v32, %v265_v30 }
 0x1fb   :  { %674 = vmatpush3.bf16.msra.mxu1 %v267_v35  ;;  %680 = vmatpush3.bf16.msra.mxu0 %v260_v34 }
 0x1fc   :  { %704 = vmatprep.subr.msk.bf16.mxu1 %vm201_vm2, %v410_v33  ;;  %691 = vmatprep.subr.bf16.mxu0 %v1004_v9 }
 0x1fe   :  { %676 = vmatmul.mubr.msk.bf16.vlgmr.msra.gmra.mrb[0].mxu1 %vm268_vm4, %v156_v36  ;;  %682 = vmatmul.mubr.msk.bf16.vlgmr.msra.gmra.mrb[4].mxu0 %vm268_vm4, %v155_v37 }
 0x1ff   :  { %686 = vmatpush3.bf16.msra.mxu1 %v412_v38  ;;  %687 = vmatprep.mubr.msk.bf16.mxu1 %vm194_vm0, %v724_v1 }
 0x200   :  { %697 = vmatprep.subr.bf16.mxu1 %v1004_v9  ;;  %693 = vmatprep.mubr.msk.bf16.mxu0 %vm1005_vm3, %v1004_v9 }
 0x206   :  { %688 = vmatmul.mubr.msk.bf16.vlgmr.msra.gmra.mrb[4].mxu1 %vm194_vm0, %v725_v8 }
 0x207   :  { %699 = vmatprep.mubr.msk.bf16.mxu1 %vm1005_vm3, %v1004_v9 }
 0x2d1   :  { %v306_v39 = vpop.f32.mrb[0].mxu1  ;;  %v349_v40 = vpop.f32.mrb[4].mxu0 }
 0x2d2   :  { %v350_v41 = vadd.f32 %v349_v40, %v306_v39  ;;  %v677_v42 = vpop.f32.mrb[1].mxu1  ;;  %v683_v43 = vpop.f32.mrb[5].mxu0 }
 0x2d3   :  { %v309_v44 = vpop.f32.mrb[2].mxu1  ;;  %v352_v45 = vpop.f32.mrb[6].mxu0 }
 0x2d4   :  { %v355_v46 = vadd.f32 %v350_v41, %v1200_v5  ;;  %v678_v47 = vpop.f32.mrb[3].mxu1  ;;  %v684_v48 = vpop.f32.mrb[7].mxu0 }
 0x2d6   :  { %374 = vrot.lane.b32.xlu1 %v355_v46, %s1006_s8  ;;  %v356_v19 = vsel %vm181_vm1, %v355_v46, 0.0 }
 0x2d9   :  { %v689_v49 = vpop.f32.mrb[4].mxu1 }
 0x2da   :  { %v465_v50 = vmul.f32 %v689_v49, %v159_v11  ;;  %v472_v51 = vmul.f32 %v689_v49, %v157_v10  ;;  %v448_v52 = vpop.f32.mrb[5].mxu1 }
 0x2db   :  { %v463_v53 = vmul.f32 %v448_v52, %v157_v10  ;;  %v470_v54 = vmul.f32 %v448_v52, %v159_v11  ;;  %v690_v55 = vpop.f32.mrb[6].mxu1  ;;  %v642_v52 = vld [vmem:[#allocation16] ss:$0 sm:$0xff] }
 0x2dc   :  { %v466_v56 = vmul.f32 %v690_v55, %v1211_v14  ;;  %v473_v57 = vmul.f32 %v690_v55, %v1209_v13  ;;  %v451_v58 = vpop.f32.mrb[7].mxu1 }
 0x2dd   :  { %v467_v59 = vsub.f32 %v463_v53, %v465_v50  ;;  %v474_v60 = vadd.f32 %v472_v51, %v470_v54  ;;  %v464_v61 = vmul.f32 %v451_v58, %v1209_v13  ;;  %v471_v62 = vmul.f32 %v451_v58, %v1211_v14  ;;  %v641_v50 = vld [vmem:[#allocation14] ss:$0 sm:$0xff] }
 0x2df   :  { %v468_v63 = vsub.f32 %v464_v61, %v466_v56  ;;  %v475_v0 = vadd.f32 %v473_v57, %v471_v62 }
 0x2e1   :  { %v469_v1 = vpack.c.bf16 %v468_v63, %v467_v59  ;;  %v476_v2 = vpack.c.bf16 %v475_v0, %v474_v60 }
 0x2e3   :  { %692 = vmatpush3.bf16.msra.mxu0 %v476_v2  ;;  %698 = vmatpush3.bf16.msra.mxu1 %v469_v1 }
 0x2e6   :  { %694 = vmatmul.mubr.msk.bf16.vlgmr.msra.gmra.mrb[8].mxu0 %vm268_vm4, %v156_v36  ;;  %700 = vmatmul.mubr.msk.bf16.vlgmr.msra.gmra.mrb[8].mxu1 %vm268_vm4, %v155_v37 }
 0x348   :  { %v375_v3 = vpop.permute.xlu1 %374 }
 0x349   :  { %v377_v4 = vsel %vm181_vm1, %v375_v3, 0.0 }
 0x34a   :  { %378 = vadd.xlane.f32.xlu0 %v377_v4 }
 0x3b9   :  { %v511_v5 = vpop.f32.mrb[8].mxu0  ;;  %v551_v6 = vpop.f32.mrb[8].mxu1 }
 0x3ba   :  { %v552_v7 = vadd.f32 %v551_v6, %v511_v5  ;;  %v695_v8 = vpop.f32.mrb[9].mxu0  ;;  %v701_v9 = vpop.f32.mrb[9].mxu1 }
 0x3bb   :  { %v514_v10 = vpop.f32.mrb[10].mxu0  ;;  %v554_v11 = vpop.f32.mrb[10].mxu1 }
 0x3bc   :  { %v557_v12 = vadd.f32 %v552_v7, %v1216_v26  ;;  %v702_v13 = vpop.f32.mrb[11].mxu1  ;;  %v696_v14 = vpop.f32.mrb[11].mxu0 }
 0x3be   :  { %576 = vrot.lane.b32.xlu1 %v557_v12, %s1006_s8  ;;  %v558_v31 = vsel %vm181_vm1, %v557_v12, 0.0 }
 0x3d7   :  { %v379_v15 = vpop.xlane.xlu0 %378 }
 0x3d8   :  { %v380_v16 = vmul.f32 0.03125, %v379_v15 }
 0x3da   :  { %v381_v17 = vsub.f32 %v355_v46, %v380_v16 }
 0x3dc   :  { %v382_v18 = vmul.f32 %v381_v17, %v381_v17 }
 0x3de   :  { %384 = vrot.lane.b32.xlu0 %v382_v18, %s1006_s8 }
 0x3fd   :  { %357 = vadd.xlane.f32.xlu0 %v356_v19 }
 0x430   :  { %v577_v20 = vpop.permute.xlu1 %576 }
 0x431   :  { %v579_v21 = vsel %vm181_vm1, %v577_v20, 0.0 }
 0x432   :  { %580 = vadd.xlane.f32.xlu1 %v579_v21 }
 0x450   :  { %v385_v22 = vpop.permute.xlu0 %384 }
 0x451   :  { %v387_v23 = vsel %vm181_vm1, %v385_v22, 0.0 }
 0x452   :  { %388 = vadd.xlane.f32.xlu0 %v387_v23 }
 0x48a   :  { %v358_v28 = vpop.xlane.xlu0 %357 }
 0x48b   :  { %v360_v29 = vmul.f32 0.03125, %v358_v28 }
 0x48d   :  { %v361_v30 = vsub.f32 %v355_v46, %v360_v29 }
 0x48f   :  { %v362_v32 = vmul.f32 %v361_v30, %v361_v30 }
 0x491   :  { %v363_v33 = vsel %vm181_vm1, %v362_v32, 0.0 }
 0x4bf   :  { %v581_v24 = vpop.xlane.xlu1 %580 }
 0x4c0   :  { %v582_v25 = vmul.f32 0.03125, %v581_v24 }
 0x4c2   :  { %v583_v26 = vsub.f32 %v557_v12, %v582_v25 }
 0x4c4   :  { %v584_v27 = vmul.f32 %v583_v26, %v583_v26 }
 0x4c6   :  { %586 = vrot.lane.b32.xlu1 %v584_v27, %s1006_s8 }
 0x4df   :  { %v389_v34 = vpop.xlane.xlu0 %388 }
 0x4e0   :  { %v390_v36 = vmul.f32 0.03125, %v389_v34 }
 0x4e2   :  { %v391_v38 = vadd.f32 1e-12, %v390_v36 }
 0x4e4   :  { %726 = vrsqrt.f32 %v391_v38 }
 0x4ea   :  { %559 = vadd.xlane.f32.xlu1 %v558_v31 }
 0x4ee   :  { %364 = vadd.xlane.f32.xlu1 %v363_v33  ;;  %v727_v39 = vpop.eup %726 }
 0x4ef   :  { %v393_v40 = vmul.f32 %v727_v39, %v381_v17 }
 0x538   :  { %v587_v35 = vpop.permute.xlu1 %586 }
 0x539   :  { %v589_v37 = vsel %vm181_vm1, %v587_v35, 0.0 }
 0x53a   :  { %590 = vadd.xlane.f32.xlu0 %v589_v37 }
 0x550   :  { %395 = vrot.lane.b32.xlu0 %v393_v40, %s1006_s8 }
 0x577   :  { %v560_v41 = vpop.xlane.xlu1 %559 }
 0x578   :  { %v561_v42 = vmul.f32 0.03125, %v560_v41 }
 0x57a   :  { %v562_v43 = vsub.f32 %v557_v12, %v561_v42 }
 0x57b   :  { %v365_v44 = vpop.xlane.xlu1 %364 }
 0x57c   :  { %v366_v45 = vmul.f32 0.03125, %v365_v44  ;;  %v563_v46 = vmul.f32 %v562_v43, %v562_v43 }
 0x57e   :  { %v367_v47 = vadd.f32 1e-12, %v366_v45  ;;  %v564_v48 = vsel %vm181_vm1, %v563_v46, 0.0 }
 0x57f   :  { %565 = vadd.xlane.f32.xlu1 %v564_v48 }
 0x580   :  { %728 = vrsqrt.f32 %v367_v47 }
 0x58a   :  { %v729_v49 = vpop.eup %728 }
 0x58b   :  { %v369_v51 = vmul.f32 %v729_v49, %v361_v30 }
 0x58d   :  { %v370_v53 = vmul.f32 %v641_v50, %v369_v51 }
 0x58f   :  { %v371_v54 = vadd.f32 %v642_v52, %v370_v53 }
 0x591   :  { %372 = vst.msk [vmem:[#allocation17] sm:$0xff] %vm181_vm1, %v371_v54 }
 0x5c7   :  { %v591_v55 = vpop.xlane.xlu0 %590 }
 0x5c8   :  { %v592_v56 = vmul.f32 0.03125, %v591_v55 }
 0x5ca   :  { %v593_v57 = vadd.f32 1e-12, %v592_v56 }
 0x5cb   :  { %v396_v58 = vpop.permute.xlu0 %395 }
 0x5cc   :  { %730 = vrsqrt.f32 %v593_v57  ;;  %v398_v59 = vmul.f32 %v641_v50, %v396_v58 }
 0x5ce   :  { %v399_v60 = vadd.f32 %v642_v52, %v398_v59 }
 0x5d0   :  { %400 = vst.msk [vmem:[#allocation18] sm:$0xff] %vm181_vm1, %v399_v60 }
 0x5d6   :  { %v731_v61 = vpop.eup %730 }
 0x5d7   :  { %v595_v62 = vmul.f32 %v731_v61, %v583_v26 }
 0x5d9   :  { %597 = vrot.lane.b32.xlu1 %v595_v62, %s1006_s8 }
 0x60c   :  { %v566_v63 = vpop.xlane.xlu1 %565 }
 0x60d   :  { %v567_v0 = vmul.f32 0.03125, %v566_v63 }
 0x60f   :  { %v568_v1 = vadd.f32 1e-12, %v567_v0 }
 0x611   :  { %732 = vrsqrt.f32 %v568_v1 }
 0x61b   :  { %v733_v2 = vpop.eup %732 }
 0x61c   :  { %v570_v3 = vmul.f32 %v733_v2, %v562_v43 }
 0x61e   :  { %v571_v4 = vmul.f32 %v641_v50, %v570_v3 }
 0x620   :  { %v572_v5 = vadd.f32 %v642_v52, %v571_v4 }
 0x622   :  { %574 = vst.msk [vmem:[#allocation17 + $0x8] sm:$0xff] %vm181_vm1, %v572_v5 }
 0x623   :  { %943 = shalt.err (!%p940_p6)
}
 0x624   :  { %s944_s23 = scalar_lea.hbm %s1295_s9, 256 }
 0x625   :  { %p945_p7 = scmp.ne.s32.totalorder %s1295_s9, %s944_s23  ;;  %p948_p8 = scmp.lt.u32.totalorder %s944_s23, %s1295_s9 }
 0x627   :  { %p950_p9 = pnand %p948_p8, %p945_p7 }
 0x629   :  { %953 = shalt.err (!%p950_p9)
}
 0x62a   :  { %615 = dma.vmem_to_hbm [thread:$0]  %s610_s1, 256, %s1295_s9, [#allocation4], %s992_s25, %s992_s25, %s993_s26  }
 0x62b   :  { %s1008_s28 = smov [#allocation18]  }
 0x62c   :  { %s621_s30 = sshll.u32 %s1008_s28, 4  ;;  %s622_s30 = int_to_ptr.vmem [resolvable:$true] %s621_s30 }
 0x62d   :  { %s954_s11 = scalar_lea.vmem %s622_s30, 256  ;;  %p959_p11 = scmp.lt.s32.totalorder %s622_s30, %s622_s30 }
 0x62e   :  { %p955_p10 = scmp.ne.s32.totalorder %s622_s30, %s954_s11  ;;  %p960_p12 = scmp.lt.s32.totalorder %s954_s11, %s954_s11 }
 0x630   :  { %p961_p13 = por %p960_p12, %p959_p11 }
 0x632   :  { %p962_p0 = pnand %p961_p13, %p955_p10 }
 0x64b   :  { %v598_v6 = vpop.permute.xlu1 %597 }
 0x64c   :  { %v600_v7 = vmul.f32 %v641_v50, %v598_v6 }
 0x64e   :  { %v601_v8 = vadd.f32 %v642_v52, %v600_v7 }
 0x650   :  { %603 = vst.msk [vmem:[#allocation18 + $0x8] sm:$0xff] %vm181_vm1, %v601_v8 }
 0x651   :  { %965 = shalt.err (!%p962_p0)
}
 0x652   :  { %s966_s13 = scalar_lea.hbm %s1296_s10, 256 }
 0x653   :  { %p967_p1 = scmp.ne.s32.totalorder %s1296_s10, %s966_s13  ;;  %p970_p2 = scmp.lt.u32.totalorder %s966_s13, %s1296_s10 }
 0x655   :  { %p972_p3 = pnand %p970_p2, %p967_p1 }
 0x657   :  { %975 = shalt.err (!%p972_p3)
}
 0x658   :  { %627 = dma.vmem_to_hbm [thread:$0]  %s622_s30, 256, %s1296_s10, [#allocation19], %s992_s25, %s992_s25, %s993_s26  }
 0x659   :  { %986 = dma.done.wait [#allocation4], 256  }
 0x65a   :  { %987 = vsyncadd [#allocation4], 4294967040 }
 0x65b   :  { %988 = dma.done.wait [#allocation19], 256  }
 0x65c   :  { %989 = vsyncadd [#allocation19], 4294967040 }
 0x65d   :  { %634 = vsyncpa [#allocation3], 1 }
 0x65e   :  { %635 = vsyncpa [#allocation6], 1 }
 0x65f   :  { %636 = vsyncpa [#allocation9], 1 }
 0x660   :  { %637 = vsyncpa [#allocation12], 1 }
 0x661   :  { %638 = vsyncpa [#allocation15], 1 }
 0x662   :  { %639 = vsyncpa [#allocation4], 1 }
 0x663   :  { %640 = vsyncpa [#allocation19], 1 }

</bundles_post_ra>
